<compile_context>
chip_gen: v7x
topology: tpu7x:2x2x1
jax: 0.10.0
libtpu: 0.0.40
codegen_flags: <defaults>
</compile_context>

<pallas_src>
import functools

import numpy as np
import jax
import jax.numpy as jnp
from jax.experimental import pallas as pl
from jax.experimental.pallas import tpu as pltpu

# ----------------------------- model hyper-params -----------------------------
INPUT_SIZE = 16       # F  (input feature dim)
CONV_SIZE = 8         # C  (conv channels in the subsampling front-end)
OUTPUT_SIZE = 32      # D  (encoder hidden / output dim)
NUM_BODY_BLOCKS = 2
BODY_KERNEL = 3
SUBSAMPLING_FACTOR = 4
LN_EPS = 1e-12


def _conv_out(n):
    # torch Conv2d(kernel=3, stride=2, padding=0) output length
    return (n - 3) // 2 + 1


def _pick_bblk(B):
    """Largest batch block that still yields >= 2 grid steps (v7x megacore)."""
    if B <= 1:
        return 1
    target = max(1, B // 2)
    for bb in range(target, 0, -1):
        if B % bb == 0:
            return bb
    return 1


# ------------------------ packed-parameter layout (static) ---------------------
def _param_layout(F):
    """Static (offset, rows, cols) layout of the single packed parameter array.

    Pure function of the feature dim F and the hyper-parameters, so it can be
    re-derived at trace time (offsets stay Python ints)."""
    C, D, K = CONV_SIZE, OUTPUT_SIZE, BODY_KERNEL
    f1 = _conv_out(F)
    f2 = _conv_out(f1)

    entries = []
    for kh in range(3):
        entries.append((f"w1_{kh}", F, f1 * C))
    entries.append(("b1", 1, f1 * C))
    for kh in range(3):
        entries.append((f"w2_{kh}", f1 * C, f2 * C))
    entries.append(("b2", 1, f2 * C))
    entries.append(("wout", f2 * C, D))
    entries.append(("bout", 1, D))
    for n in range(NUM_BODY_BLOCKS):
        for j in range(K):
            entries.append((f"body{n}_w{j}", D, D))
        entries.append((f"body{n}_b", 1, D))
    entries.append(("ln_g", 1, D))
    entries.append(("ln_b", 1, D))

    layout = {}
    off = 0
    max_cols = 0
    for name, rows, cols in entries:
        layout[name] = (off, rows, cols)
        off += ((rows + 7) // 8) * 8          # sublane-align each slice start
        max_cols = max(max_cols, cols)
    lane = ((max_cols + 127) // 128) * 128    # 128-lane-padded container
    return layout, off, lane


# ------------------------------- fused Pallas kernel ---------------------------
def _encoder_kernel(x_ref, p_ref, o_ref, y1_ref, pad_ref, *,
                    bblk, f_in, t1, f1, t2, f2, n_body, layout):
    C, D = CONV_SIZE, OUTPUT_SIZE

    def par(name):
        off, rows, cols = layout[name]
        return p_ref[off:off + rows, :cols]

    # ---- conv1: Conv2d(1, C, 3, stride=2) + ReLU ----------------------------
    # Stride-2 time gather = strided sublane load; stride-2 freq gather is
    # folded into the packed per-tap weight.  Output col layout: fo*C + c.
    acc1 = jnp.zeros((bblk * t1, f1 * C), jnp.float32)
    for k in range(3):
        rows = x_ref[:, pl.ds(k, t1, stride=2), :].reshape(bblk * t1, f_in)
        acc1 = acc1 + jnp.dot(rows, par(f"w1_{k}"),
                              preferred_element_type=jnp.float32)
    y1_ref[...] = jnp.maximum(acc1 + par("b1"), 0.0).reshape(bblk, t1, f1 * C)

    # ---- conv2: Conv2d(C, C, 3, stride=2) + ReLU -----------------------------
    acc2 = jnp.zeros((bblk * t2, f2 * C), jnp.float32)
    for k in range(3):
        rows = y1_ref[:, pl.ds(k, t2, stride=2), :].reshape(bblk * t2, f1 * C)
        acc2 = acc2 + jnp.dot(rows, par(f"w2_{k}"),
                              preferred_element_type=jnp.float32)
    z2 = jnp.maximum(acc2 + par("b2"), 0.0)                       # (bblk*t2, f2*C)

    # ---- output Linear(C*F2 -> D); torch (B,C,T2,F2)->(B,T2,C*F2) flatten is
    # folded into the permuted packed weight. ----------------------------------
    h = jnp.dot(z2, par("wout"), preferred_element_type=jnp.float32) + par("bout")

    # ---- Conv1d body blocks (k=3, same padding, ReLU) via a halo scratch:
    # write h into the interior of a (bblk, t2+2, D) scratch, read three
    # sublane-offset windows, one (D,D) matmul per tap. ------------------------
    zrow = jnp.zeros((bblk, 1, D), jnp.float32)
    pad_ref[:, 0:1, :] = zrow
    pad_ref[:, t2 + 1:t2 + 2, :] = zrow
    for n in range(n_body):
        pad_ref[:, 1:t2 + 1, :] = h.reshape(bblk, t2, D)
        acc = par(f"body{n}_b")                                   # (1, D)
        for j in range(3):
            win = pad_ref[:, j:j + t2, :].reshape(bblk * t2, D)
            acc = acc + jnp.dot(win, par(f"body{n}_w{j}"),
                                preferred_element_type=jnp.float32)
        h = jnp.maximum(acc, 0.0)                                 # (bblk*t2, D)

    # ---- final LayerNorm of MultiBlocks --------------------------------------
    mu = jnp.mean(h, axis=-1, keepdims=True)
    xc = h - mu
    var = jnp.mean(xc * xc, axis=-1, keepdims=True)
    inv = jax.lax.rsqrt(var + LN_EPS)
    out = xc * inv * par("ln_g") + par("ln_b")
    o_ref[...] = out.reshape(bblk, t2, D).astype(o_ref.dtype)


def _fused_encoder_call(x, packed, t1, f1, t2, f2, layout):
    B, T, F = x.shape
    D = OUTPUT_SIZE
    bblk = _pick_bblk(B)
    grid = B // bblk

    kernel = functools.partial(
        _encoder_kernel, bblk=bblk, f_in=F, t1=t1, f1=f1, t2=t2, f2=f2,
        n_body=NUM_BODY_BLOCKS, layout=layout)

    return pl.pallas_call(
        kernel,
        out_shape=jax.ShapeDtypeStruct((B, t2, D), jnp.float32),
        grid=(grid,),
        in_specs=[
            pl.BlockSpec((bblk, T, F), lambda i: (i, 0, 0)),
            # single packed-parameter DMA; block index never changes so it is
            # fetched once for the whole grid
            pl.BlockSpec(packed.shape, lambda i: (0, 0)),
        ],
        out_specs=pl.BlockSpec((bblk, t2, D), lambda i: (i, 0, 0)),
        scratch_shapes=[
            pltpu.VMEM((bblk, t1, f1 * CONV_SIZE), jnp.float32),  # conv1 output
            pltpu.VMEM((bblk, t2 + 2, D), jnp.float32),           # body halo
        ],
        compiler_params=pltpu.CompilerParams(
            dimension_semantics=("parallel",)),
    )(x, packed)


# ----------------------------------- forward -----------------------------------
def encoder_forward(kparams, x, x_len):
    """Encoder.forward: (B, T_in, F), (B,) -> (B, T_out, D), (B,)."""
    B, T, F = x.shape
    if T < 7:  # check_short_utt for subsampling_factor == 4
        raise ValueError(
            f"has {T} frames and is too short for subsampling "
            f"(it needs more than 6 frames), return empty results")
    t1, f1 = _conv_out(T), _conv_out(F)
    t2, f2 = _conv_out(t1), _conv_out(f1)
    layout, _, _ = _param_layout(F)

    # make_source_mask: True = padded position
    mask = jnp.arange(T)[None, :] >= x_len[:, None]

    out = _fused_encoder_call(x, kparams["packed"], t1, f1, t2, f2, layout)

    # ConvInput subsampled source mask; lengths = mask.eq(0).sum(1)
    sub_mask = mask[:, : t2 * SUBSAMPLING_FACTOR : SUBSAMPLING_FACTOR]
    out_len = jnp.sum(jnp.logical_not(sub_mask), axis=1).astype(jnp.int32)

    # TODO(synk): dynamic_chunk_training path (random chunk mask) is disabled by
    # default main_conf and not implemented here.
    return out, out_len


# --------------------------- deterministic parameters ---------------------------
def init_params(key):
    f1 = _conv_out(INPUT_SIZE)
    f2 = _conv_out(f1)
    lin_in = CONV_SIZE * f2

    keys = jax.random.split(key, 6 + 2 * NUM_BODY_BLOCKS)

    def rnd(k, shape, fan_in):
        bound = 1.0 / (fan_in ** 0.5)
        return jax.random.uniform(k, shape, jnp.float32, -bound, bound)

    params = {
        "conv1_w": rnd(keys[0], (CONV_SIZE, 1, 3, 3), 9),
        "conv1_b": rnd(keys[1], (CONV_SIZE,), 9),
        "conv2_w": rnd(keys[2], (CONV_SIZE, CONV_SIZE, 3, 3), CONV_SIZE * 9),
        "conv2_b": rnd(keys[3], (CONV_SIZE,), CONV_SIZE * 9),
        "out_w": rnd(keys[4], (OUTPUT_SIZE, lin_in), lin_in),   # torch Linear (D, C*F2)
        "out_b": rnd(keys[5], (OUTPUT_SIZE,), lin_in),
        "body": [],
        "ln_g": jnp.ones((OUTPUT_SIZE,), jnp.float32),
        "ln_b": jnp.zeros((OUTPUT_SIZE,), jnp.float32),
    }
    for n in range(NUM_BODY_BLOCKS):
        fan = OUTPUT_SIZE * BODY_KERNEL
        params["body"].append({
            # torch Conv1d weight layout (Dout, Din, K)
            "w": rnd(keys[6 + 2 * n], (OUTPUT_SIZE, OUTPUT_SIZE, BODY_KERNEL), fan),
            "b": rnd(keys[7 + 2 * n], (OUTPUT_SIZE,), fan),
        })
    return params


def prepare_kernel_params(params, F):
    """One-time host-side prep: fold the stride-2 frequency gathers and torch
    reshapes into dense per-tap matrices and pack EVERYTHING into one
    128-lane-padded array (single DMA, static in-kernel slices)."""
    C, D, K = CONV_SIZE, OUTPUT_SIZE, BODY_KERNEL
    f1 = _conv_out(F)
    f2 = _conv_out(f1)
    layout, total_rows, lane = _param_layout(F)
    packed = np.zeros((total_rows, lane), np.float32)

    def put(name, arr):
        off, rows, cols = layout[name]
        arr = np.asarray(arr, np.float32)
        assert arr.shape == (rows, cols), (name, arr.shape, (rows, cols))
        packed[off:off + rows, :cols] = arr

    w1 = np.asarray(params["conv1_w"], np.float32)   # (C, 1, 3, 3)
    b1 = np.asarray(params["conv1_b"], np.float32)
    w2 = np.asarray(params["conv2_w"], np.float32)   # (C, C, 3, 3)
    b2 = np.asarray(params["conv2_b"], np.float32)
    wout = np.asarray(params["out_w"], np.float32)   # (D, C*f2)
    bout = np.asarray(params["out_b"], np.float32)

    # conv1 per-tap weight with the stride-2 frequency gather folded in:
    # w1tap[kh][2*fo+kw, fo*C + c] = w1[c, 0, kh, kw]
    for kh in range(3):
        w1tap = np.zeros((F, f1 * C), np.float32)
        for kw in range(3):
            for fo in range(f1):
                w1tap[2 * fo + kw, fo * C:(fo + 1) * C] = w1[:, 0, kh, kw]
        put(f"w1_{kh}", w1tap)
    put("b1", np.tile(b1, f1).reshape(1, f1 * C))

    # conv2 per-tap weight on the (f1*C) column layout
    for kh in range(3):
        w2tap = np.zeros((f1 * C, f2 * C), np.float32)
        for kw in range(3):
            for fo in range(f2):
                for ci in range(C):
                    w2tap[(2 * fo + kw) * C + ci,
                          fo * C:(fo + 1) * C] = w2[:, ci, kh, kw]
        put(f"w2_{kh}", w2tap)
    put("b2", np.tile(b2, f2).reshape(1, f2 * C))

    # output Linear with torch's (f, c) -> (c*F2 + f) flatten folded in
    wout_perm = np.zeros((f2 * C, D), np.float32)
    for f in range(f2):
        for c in range(C):
            wout_perm[f * C + c, :] = wout[:, c * f2 + f]
    put("wout", wout_perm)
    put("bout", bout.reshape(1, D))

    # Conv1d body blocks: per-tap (Din, Dout) weights
    for n, blk in enumerate(params["body"]):
        w = np.asarray(blk["w"], np.float32)           # (Dout, Din, K)
        for j in range(K):
            put(f"body{n}_w{j}", w[:, :, j].T)         # (Din, Dout)
        put(f"body{n}_b", np.asarray(blk["b"], np.float32).reshape(1, D))

    put("ln_g", np.asarray(params["ln_g"], np.float32).reshape(1, D))
    put("ln_b", np.asarray(params["ln_b"], np.float32).reshape(1, D))

    return {"packed": jnp.asarray(packed)}


# ------------------------------ pure-JAX reference ------------------------------
def _reference_forward(params, x):
    """Straightforward XLA implementation for correctness checking."""
    B, T, F = x.shape
    C, D = CONV_SIZE, OUTPUT_SIZE
    t1, f1 = _conv_out(T), _conv_out(F)
    t2, f2 = _conv_out(t1), _conv_out(f1)

    x4 = x[:, None, :, :]
    y1 = jax.lax.conv_general_dilated(
        x4, params["conv1_w"], (2, 2), "VALID",
        dimension_numbers=("NCHW", "OIHW", "NCHW"))
    y1 = jax.nn.relu(y1 + params["conv1_b"][None, :, None, None])
    y2 = jax.lax.conv_general_dilated(
        y1, params["conv2_w"], (2, 2), "VALID",
        dimension_numbers=("NCHW", "OIHW", "NCHW"))
    y2 = jax.nn.relu(y2 + params["conv2_b"][None, :, None, None])
    h = jnp.transpose(y2, (0, 2, 1, 3)).reshape(B, t2, C * f2)
    h = h @ params["out_w"].T + params["out_b"]
    for blk in params["body"]:
        w = blk["w"]                                   # (Dout, Din, K)
        hp = jnp.pad(h, ((0, 0), (1, 1), (0, 0)))
        out = jnp.zeros_like(h)
        for j in range(BODY_KERNEL):
            out = out + jnp.einsum("btd,od->bto", hp[:, j:j + t2, :], w[:, :, j])
        h = jax.nn.relu(out + blk["b"][None, None, :])
    mu = h.mean(-1, keepdims=True)
    var = ((h - mu) ** 2).mean(-1, keepdims=True)
    return (h - mu) * jax.lax.rsqrt(var + LN_EPS) * params["ln_g"] + params["ln_b"]


# ------------------------------------ main --------------------------------------
if __name__ == "__main__":
    key = jax.random.PRNGKey(0)
    pkey, xkey = jax.random.split(key)
    params = init_params(pkey)

    B, T, F = 2, 16, INPUT_SIZE
    kparams = prepare_kernel_params(params, F)

    x = jax.random.normal(xkey, (B, T, F), jnp.float32)
    x_len = jnp.array([16, 6], jnp.int32)

    fwd = jax.jit(encoder_forward)
    y, y_len = fwd(kparams, x, x_len)
    jax.block_until_ready(y)
    jax.block_until_ready(y_len)

    t2 = _conv_out(_conv_out(T))
    assert y.shape == (B, t2, OUTPUT_SIZE), y.shape
    assert y_len.shape == (B,), y_len.shape

    # sanity check against the plain-XLA reference (loose tol: precision-mode
    # differences between MXU paths only; structural bugs would be O(1))
    ref = _reference_forward(params, x)
    max_err = float(jnp.max(jnp.abs(y - ref)))
    assert max_err < 5e-2, f"max abs error {max_err}"

    print("KERNEL_OK")
</pallas_src>

<mosaic_0001>
module attributes {stable_mosaic.version = 11 : i64} {
  func.func @_encoder_kernel(%arg0: i32, %arg1: memref<1x16x16xf32, #tpu.memory_space<vmem>>, %arg2: memref<488x128xf32, #tpu.memory_space<vmem>>, %arg3: memref<1x3x32xf32, #tpu.memory_space<vmem>>, %arg4: memref<1x7x56xf32, #tpu.memory_space<vmem>>, %arg5: memref<1x5x32xf32, #tpu.memory_space<vmem>>) attributes {dimension_semantics = [#tpu.dimension_semantics<parallel>], iteration_bounds = array<i64: 2>, scalar_prefetch = 0 : i64, scratch_operands = 2 : i64, tpu.core_type = #tpu.core_type<tc>, window_params = [{transform_indices = @transform_0, window_bounds = array<i64: 1, 16, 16>}, {pipeline_mode = #tpu.pipeline_mode<synchronous>, transform_indices = @transform_1, window_bounds = array<i64: 488, 128>}, {transform_indices = @transform_2, window_bounds = array<i64: 1, 3, 32>}]} {
    %cst = arith.constant 0.000000e+00 : f32
    %0 = vector.broadcast %cst : f32 to vector<7x56xf32>
    %c0 = arith.constant 0 : index
    %c0_0 = arith.constant 0 : index
    %c0_1 = arith.constant 0 : index
    %1 = tpu.strided_load %arg1[%c0, %c0_0, %c0_1] {strides = array<i32: 1, 2, 1>} : memref<1x16x16xf32, #tpu.memory_space<vmem>>, vector<1x7x16xf32>
    %2 = vector.shape_cast %1 : vector<1x7x16xf32> to vector<7x16xf32>
    %c0_2 = arith.constant 0 : index
    %c0_3 = arith.constant 0 : index
    %3 = vector.load %arg2[%c0_2, %c0_3] : memref<488x128xf32, #tpu.memory_space<vmem>>, vector<16x56xf32>
    %cst_4 = arith.constant dense<0.000000e+00> : vector<7x56xf32>
    %4 = tpu.matmul %2, %3, %cst_4 {dimension_numbers = #tpu.dot_dimension_numbers<[1], [0], [0], [1], [0, 0, 1, 1], [], []>} : vector<7x16xf32>, vector<16x56xf32>, vector<7x56xf32> -> vector<7x56xf32>
    %5 = arith.addf %0, %4 : vector<7x56xf32>
    %c0_5 = arith.constant 0 : index
    %c1 = arith.constant 1 : index
    %c0_6 = arith.constant 0 : index
    %6 = tpu.strided_load %arg1[%c0_5, %c1, %c0_6] {strides = array<i32: 1, 2, 1>} : memref<1x16x16xf32, #tpu.memory_space<vmem>>, vector<1x7x16xf32>
    %7 = vector.shape_cast %6 : vector<1x7x16xf32> to vector<7x16xf32>
    %c16 = arith.constant 16 : index
    %c0_7 = arith.constant 0 : index
    %8 = vector.load %arg2[%c16, %c0_7] : memref<488x128xf32, #tpu.memory_space<vmem>>, vector<16x56xf32>
    %cst_8 = arith.constant dense<0.000000e+00> : vector<7x56xf32>
    %9 = tpu.matmul %7, %8, %cst_8 {dimension_numbers = #tpu.dot_dimension_numbers<[1], [0], [0], [1], [0, 0, 1, 1], [], []>} : vector<7x16xf32>, vector<16x56xf32>, vector<7x56xf32> -> vector<7x56xf32>
    %10 = arith.addf %5, %9 : vector<7x56xf32>
    %c0_9 = arith.constant 0 : index
    %c2 = arith.constant 2 : index
    %c0_10 = arith.constant 0 : index
    %11 = tpu.strided_load %arg1[%c0_9, %c2, %c0_10] {strides = array<i32: 1, 2, 1>} : memref<1x16x16xf32, #tpu.memory_space<vmem>>, vector<1x7x16xf32>
    %12 = vector.shape_cast %11 : vector<1x7x16xf32> to vector<7x16xf32>
    %c32 = arith.constant 32 : index
    %c0_11 = arith.constant 0 : index
    %13 = vector.load %arg2[%c32, %c0_11] : memref<488x128xf32, #tpu.memory_space<vmem>>, vector<16x56xf32>
    %cst_12 = arith.constant dense<0.000000e+00> : vector<7x56xf32>
    %14 = tpu.matmul %12, %13, %cst_12 {dimension_numbers = #tpu.dot_dimension_numbers<[1], [0], [0], [1], [0, 0, 1, 1], [], []>} : vector<7x16xf32>, vector<16x56xf32>, vector<7x56xf32> -> vector<7x56xf32>
    %15 = arith.addf %10, %14 : vector<7x56xf32>
    %c48 = arith.constant 48 : index
    %c0_13 = arith.constant 0 : index
    %16 = vector.load %arg2[%c48, %c0_13] : memref<488x128xf32, #tpu.memory_space<vmem>>, vector<1x56xf32>
    %17 = vector.broadcast %16 : vector<1x56xf32> to vector<7x56xf32>
    %18 = arith.addf %15, %17 : vector<7x56xf32>
    %cst_14 = arith.constant 0.000000e+00 : f32
    %19 = vector.broadcast %cst_14 : f32 to vector<7x56xf32>
    %20 = arith.maximumf %18, %19 : vector<7x56xf32>
    %21 = vector.shape_cast %20 : vector<7x56xf32> to vector<1x7x56xf32>
    %c0_15 = arith.constant 0 : index
    %c0_16 = arith.constant 0 : index
    %c0_17 = arith.constant 0 : index
    %22 = vector.load %arg4[%c0_15, %c0_16, %c0_17] : memref<1x7x56xf32, #tpu.memory_space<vmem>>, vector<1x7x56xf32>
    tpu.vector_store %arg4[%c0_15, %c0_16, %c0_17], %21 {strides = array<i32>} : memref<1x7x56xf32, #tpu.memory_space<vmem>>, vector<1x7x56xf32>,
    %cst_18 = arith.constant 0.000000e+00 : f32
    %23 = vector.broadcast %cst_18 : f32 to vector<3x24xf32>
    %c0_19 = arith.constant 0 : index
    %c0_20 = arith.constant 0 : index
    %c0_21 = arith.constant 0 : index
    %24 = tpu.strided_load %arg4[%c0_19, %c0_20, %c0_21] {strides = array<i32: 1, 2, 1>} : memref<1x7x56xf32, #tpu.memory_space<vmem>>, vector<1x3x56xf32>
    %25 = vector.shape_cast %24 : vector<1x3x56xf32> to vector<3x56xf32>
    %c56 = arith.constant 56 : index
    %c0_22 = arith.constant 0 : index
    %26 = vector.load %arg2[%c56, %c0_22] : memref<488x128xf32, #tpu.memory_space<vmem>>, vector<56x24xf32>
    %cst_23 = arith.constant dense<0.000000e+00> : vector<3x24xf32>
    %27 = tpu.matmul %25, %26, %cst_23 {dimension_numbers = #tpu.dot_dimension_numbers<[1], [0], [0], [1], [0, 0, 1, 1], [], []>} : vector<3x56xf32>, vector<56x24xf32>, vector<3x24xf32> -> vector<3x24xf32>
    %28 = arith.addf %23, %27 : vector<3x24xf32>
    %c0_24 = arith.constant 0 : index
    %c1_25 = arith.constant 1 : index
    %c0_26 = arith.constant 0 : index
    %29 = tpu.strided_load %arg4[%c0_24, %c1_25, %c0_26] {strides = array<i32: 1, 2, 1>} : memref<1x7x56xf32, #tpu.memory_space<vmem>>, vector<1x3x56xf32>
    %30 = vector.shape_cast %29 : vector<1x3x56xf32> to vector<3x56xf32>
    %c112 = arith.constant 112 : index
    %c0_27 = arith.constant 0 : index
    %31 = vector.load %arg2[%c112, %c0_27] : memref<488x128xf32, #tpu.memory_space<vmem>>, vector<56x24xf32>
    %cst_28 = arith.constant dense<0.000000e+00> : vector<3x24xf32>
    %32 = tpu.matmul %30, %31, %cst_28 {dimension_numbers = #tpu.dot_dimension_numbers<[1], [0], [0], [1], [0, 0, 1, 1], [], []>} : vector<3x56xf32>, vector<56x24xf32>, vector<3x24xf32> -> vector<3x24xf32>
    %33 = arith.addf %28, %32 : vector<3x24xf32>
    %c0_29 = arith.constant 0 : index
    %c2_30 = arith.constant 2 : index
    %c0_31 = arith.constant 0 : index
    %34 = tpu.strided_load %arg4[%c0_29, %c2_30, %c0_31] {strides = array<i32: 1, 2, 1>} : memref<1x7x56xf32, #tpu.memory_space<vmem>>, vector<1x3x56xf32>
    %35 = vector.shape_cast %34 : vector<1x3x56xf32> to vector<3x56xf32>
    %c168 = arith.constant 168 : index
    %c0_32 = arith.constant 0 : index
    %36 = vector.load %arg2[%c168, %c0_32] : memref<488x128xf32, #tpu.memory_space<vmem>>, vector<56x24xf32>
    %cst_33 = arith.constant dense<0.000000e+00> : vector<3x24xf32>
    %37 = tpu.matmul %35, %36, %cst_33 {dimension_numbers = #tpu.dot_dimension_numbers<[1], [0], [0], [1], [0, 0, 1, 1], [], []>} : vector<3x56xf32>, vector<56x24xf32>, vector<3x24xf32> -> vector<3x24xf32>
    %38 = arith.addf %33, %37 : vector<3x24xf32>
    %c224 = arith.constant 224 : index
    %c0_34 = arith.constant 0 : index
    %39 = vector.load %arg2[%c224, %c0_34] : memref<488x128xf32, #tpu.memory_space<vmem>>, vector<1x24xf32>
    %40 = vector.broadcast %39 : vector<1x24xf32> to vector<3x24xf32>
    %41 = arith.addf %38, %40 : vector<3x24xf32>
    %cst_35 = arith.constant 0.000000e+00 : f32
    %42 = vector.broadcast %cst_35 : f32 to vector<3x24xf32>
    %43 = arith.maximumf %41, %42 : vector<3x24xf32>
    %c232 = arith.constant 232 : index
    %c0_36 = arith.constant 0 : index
    %44 = vector.load %arg2[%c232, %c0_36] : memref<488x128xf32, #tpu.memory_space<vmem>>, vector<24x32xf32>
    %cst_37 = arith.constant dense<0.000000e+00> : vector<3x32xf32>
    %45 = tpu.matmul %43, %44, %cst_37 {dimension_numbers = #tpu.dot_dimension_numbers<[1], [0], [0], [1], [0, 0, 1, 1], [], []>} : vector<3x24xf32>, vector<24x32xf32>, vector<3x32xf32> -> vector<3x32xf32>
    %c256 = arith.constant 256 : index
    %c0_38 = arith.constant 0 : index
    %46 = vector.load %arg2[%c256, %c0_38] : memref<488x128xf32, #tpu.memory_space<vmem>>, vector<1x32xf32>
    %47 = vector.broadcast %46 : vector<1x32xf32> to vector<3x32xf32>
    %48 = arith.addf %45, %47 : vector<3x32xf32>
    %cst_39 = arith.constant 0.000000e+00 : f32
    %49 = vector.broadcast %cst_39 : f32 to vector<1x1x32xf32>
    %c0_40 = arith.constant 0 : index
    %c0_41 = arith.constant 0 : index
    %c0_42 = arith.constant 0 : index
    %50 = vector.load %arg5[%c0_40, %c0_41, %c0_42] : memref<1x5x32xf32, #tpu.memory_space<vmem>>, vector<1x1x32xf32>
    tpu.vector_store %arg5[%c0_40, %c0_41, %c0_42], %49 {strides = array<i32>} : memref<1x5x32xf32, #tpu.memory_space<vmem>>, vector<1x1x32xf32>,
    %c0_43 = arith.constant 0 : index
    %c4 = arith.constant 4 : index
    %c0_44 = arith.constant 0 : index
    %51 = vector.load %arg5[%c0_43, %c4, %c0_44] : memref<1x5x32xf32, #tpu.memory_space<vmem>>, vector<1x1x32xf32>
    tpu.vector_store %arg5[%c0_43, %c4, %c0_44], %49 {strides = array<i32>} : memref<1x5x32xf32, #tpu.memory_space<vmem>>, vector<1x1x32xf32>,
    %52 = vector.shape_cast %48 : vector<3x32xf32> to vector<1x3x32xf32>
    %c0_45 = arith.constant 0 : index
    %c1_46 = arith.constant 1 : index
    %c0_47 = arith.constant 0 : index
    %53 = vector.load %arg5[%c0_45, %c1_46, %c0_47] : memref<1x5x32xf32, #tpu.memory_space<vmem>>, vector<1x3x32xf32>
    tpu.vector_store %arg5[%c0_45, %c1_46, %c0_47], %52 {strides = array<i32>} : memref<1x5x32xf32, #tpu.memory_space<vmem>>, vector<1x3x32xf32>,
    %c360 = arith.constant 360 : index
    %c0_48 = arith.constant 0 : index
    %54 = vector.load %arg2[%c360, %c0_48] : memref<488x128xf32, #tpu.memory_space<vmem>>, vector<1x32xf32>
    %c0_49 = arith.constant 0 : index
    %c0_50 = arith.constant 0 : index
    %c0_51 = arith.constant 0 : index
    %55 = vector.load %arg5[%c0_49, %c0_50, %c0_51] : memref<1x5x32xf32, #tpu.memory_space<vmem>>, vector<1x3x32xf32>
    %56 = vector.shape_cast %55 : vector<1x3x32xf32> to vector<3x32xf32>
    %c264 = arith.constant 264 : index
    %c0_52 = arith.constant 0 : index
    %57 = vector.load %arg2[%c264, %c0_52] : memref<488x128xf32, #tpu.memory_space<vmem>>, vector<32x32xf32>
    %cst_53 = arith.constant dense<0.000000e+00> : vector<3x32xf32>
    %58 = tpu.matmul %56, %57, %cst_53 {dimension_numbers = #tpu.dot_dimension_numbers<[1], [0], [0], [1], [0, 0, 1, 1], [], []>} : vector<3x32xf32>, vector<32x32xf32>, vector<3x32xf32> -> vector<3x32xf32>
    %59 = vector.broadcast %54 : vector<1x32xf32> to vector<3x32xf32>
    %60 = arith.addf %59, %58 : vector<3x32xf32>
    %c0_54 = arith.constant 0 : index
    %c1_55 = arith.constant 1 : index
    %c0_56 = arith.constant 0 : index
    %61 = vector.load %arg5[%c0_54, %c1_55, %c0_56] : memref<1x5x32xf32, #tpu.memory_space<vmem>>, vector<1x3x32xf32>
    %62 = vector.shape_cast %61 : vector<1x3x32xf32> to vector<3x32xf32>
    %c296 = arith.constant 296 : index
    %c0_57 = arith.constant 0 : index
    %63 = vector.load %arg2[%c296, %c0_57] : memref<488x128xf32, #tpu.memory_space<vmem>>, vector<32x32xf32>
    %cst_58 = arith.constant dense<0.000000e+00> : vector<3x32xf32>
    %64 = tpu.matmul %62, %63, %cst_58 {dimension_numbers = #tpu.dot_dimension_numbers<[1], [0], [0], [1], [0, 0, 1, 1], [], []>} : vector<3x32xf32>, vector<32x32xf32>, vector<3x32xf32> -> vector<3x32xf32>
    %65 = arith.addf %60, %64 : vector<3x32xf32>
    %c0_59 = arith.constant 0 : index
    %c2_60 = arith.constant 2 : index
    %c0_61 = arith.constant 0 : index
    %66 = vector.load %arg5[%c0_59, %c2_60, %c0_61] : memref<1x5x32xf32, #tpu.memory_space<vmem>>, vector<1x3x32xf32>
    %67 = vector.shape_cast %66 : vector<1x3x32xf32> to vector<3x32xf32>
    %c328 = arith.constant 328 : index
    %c0_62 = arith.constant 0 : index
    %68 = vector.load %arg2[%c328, %c0_62] : memref<488x128xf32, #tpu.memory_space<vmem>>, vector<32x32xf32>
    %cst_63 = arith.constant dense<0.000000e+00> : vector<3x32xf32>
    %69 = tpu.matmul %67, %68, %cst_63 {dimension_numbers = #tpu.dot_dimension_numbers<[1], [0], [0], [1], [0, 0, 1, 1], [], []>} : vector<3x32xf32>, vector<32x32xf32>, vector<3x32xf32> -> vector<3x32xf32>
    %70 = arith.addf %65, %69 : vector<3x32xf32>
    %cst_64 = arith.constant 0.000000e+00 : f32
    %71 = vector.broadcast %cst_64 : f32 to vector<3x32xf32>
    %72 = arith.maximumf %70, %71 : vector<3x32xf32>
    %73 = vector.shape_cast %72 : vector<3x32xf32> to vector<1x3x32xf32>
    %c0_65 = arith.constant 0 : index
    %c1_66 = arith.constant 1 : index
    %c0_67 = arith.constant 0 : index
    %74 = vector.load %arg5[%c0_65, %c1_66, %c0_67] : memref<1x5x32xf32, #tpu.memory_space<vmem>>, vector<1x3x32xf32>
    tpu.vector_store %arg5[%c0_65, %c1_66, %c0_67], %73 {strides = array<i32>} : memref<1x5x32xf32, #tpu.memory_space<vmem>>, vector<1x3x32xf32>,
    %c464 = arith.constant 464 : index
    %c0_68 = arith.constant 0 : index
    %75 = vector.load %arg2[%c464, %c0_68] : memref<488x128xf32, #tpu.memory_space<vmem>>, vector<1x32xf32>
    %c0_69 = arith.constant 0 : index
    %c0_70 = arith.constant 0 : index
    %c0_71 = arith.constant 0 : index
    %76 = vector.load %arg5[%c0_69, %c0_70, %c0_71] : memref<1x5x32xf32, #tpu.memory_space<vmem>>, vector<1x3x32xf32>
    %77 = vector.shape_cast %76 : vector<1x3x32xf32> to vector<3x32xf32>
    %c368 = arith.constant 368 : index
    %c0_72 = arith.constant 0 : index
    %78 = vector.load %arg2[%c368, %c0_72] : memref<488x128xf32, #tpu.memory_space<vmem>>, vector<32x32xf32>
    %cst_73 = arith.constant dense<0.000000e+00> : vector<3x32xf32>
    %79 = tpu.matmul %77, %78, %cst_73 {dimension_numbers = #tpu.dot_dimension_numbers<[1], [0], [0], [1], [0, 0, 1, 1], [], []>} : vector<3x32xf32>, vector<32x32xf32>, vector<3x32xf32> -> vector<3x32xf32>
    %80 = vector.broadcast %75 : vector<1x32xf32> to vector<3x32xf32>
    %81 = arith.addf %80, %79 : vector<3x32xf32>
    %c0_74 = arith.constant 0 : index
    %c1_75 = arith.constant 1 : index
    %c0_76 = arith.constant 0 : index
    %82 = vector.load %arg5[%c0_74, %c1_75, %c0_76] : memref<1x5x32xf32, #tpu.memory_space<vmem>>, vector<1x3x32xf32>
    %83 = vector.shape_cast %82 : vector<1x3x32xf32> to vector<3x32xf32>
    %c400 = arith.constant 400 : index
    %c0_77 = arith.constant 0 : index
    %84 = vector.load %arg2[%c400, %c0_77] : memref<488x128xf32, #tpu.memory_space<vmem>>, vector<32x32xf32>
    %cst_78 = arith.constant dense<0.000000e+00> : vector<3x32xf32>
    %85 = tpu.matmul %83, %84, %cst_78 {dimension_numbers = #tpu.dot_dimension_numbers<[1], [0], [0], [1], [0, 0, 1, 1], [], []>} : vector<3x32xf32>, vector<32x32xf32>, vector<3x32xf32> -> vector<3x32xf32>
    %86 = arith.addf %81, %85 : vector<3x32xf32>
    %c0_79 = arith.constant 0 : index
    %c2_80 = arith.constant 2 : index
    %c0_81 = arith.constant 0 : index
    %87 = vector.load %arg5[%c0_79, %c2_80, %c0_81] : memref<1x5x32xf32, #tpu.memory_space<vmem>>, vector<1x3x32xf32>
    %88 = vector.shape_cast %87 : vector<1x3x32xf32> to vector<3x32xf32>
    %c432 = arith.constant 432 : index
    %c0_82 = arith.constant 0 : index
    %89 = vector.load %arg2[%c432, %c0_82] : memref<488x128xf32, #tpu.memory_space<vmem>>, vector<32x32xf32>
    %cst_83 = arith.constant dense<0.000000e+00> : vector<3x32xf32>
    %90 = tpu.matmul %88, %89, %cst_83 {dimension_numbers = #tpu.dot_dimension_numbers<[1], [0], [0], [1], [0, 0, 1, 1], [], []>} : vector<3x32xf32>, vector<32x32xf32>, vector<3x32xf32> -> vector<3x32xf32>
    %91 = arith.addf %86, %90 : vector<3x32xf32>
    %cst_84 = arith.constant 0.000000e+00 : f32
    %92 = vector.broadcast %cst_84 : f32 to vector<3x32xf32>
    %93 = arith.maximumf %91, %92 : vector<3x32xf32>
    %cst_85 = arith.constant dense<0.000000e+00> : vector<3xf32>
    %94 = vector.multi_reduction <add>, %93, %cst_85 [1] : vector<3x32xf32> to vector<3xf32>
    %95 = vector.shape_cast %94 : vector<3xf32> to vector<3x1xf32>
    %cst_86 = arith.constant 3.200000e+01 : f32
    %96 = vector.broadcast %cst_86 : f32 to vector<3x1xf32>
    %97 = arith.divf %95, %96 : vector<3x1xf32>
    %98 = vector.broadcast %97 : vector<3x1xf32> to vector<3x32xf32>
    %99 = arith.subf %93, %98 : vector<3x32xf32>
    %100 = arith.mulf %99, %99 : vector<3x32xf32>
    %cst_87 = arith.constant dense<0.000000e+00> : vector<3xf32>
    %101 = vector.multi_reduction <add>, %100, %cst_87 [1] : vector<3x32xf32> to vector<3xf32>
    %102 = vector.shape_cast %101 : vector<3xf32> to vector<3x1xf32>
    %cst_88 = arith.constant 3.200000e+01 : f32
    %103 = vector.broadcast %cst_88 : f32 to vector<3x1xf32>
    %104 = arith.divf %102, %103 : vector<3x1xf32>
    %cst_89 = arith.constant 9.99999996E-13 : f32
    %105 = vector.broadcast %cst_89 : f32 to vector<3x1xf32>
    %106 = arith.addf %104, %105 : vector<3x1xf32>
    %107 = math.rsqrt %106 : vector<3x1xf32>
    %108 = vector.broadcast %107 : vector<3x1xf32> to vector<3x32xf32>
    %109 = arith.mulf %99, %108 : vector<3x32xf32>
    %c472 = arith.constant 472 : index
    %c0_90 = arith.constant 0 : index
    %110 = vector.load %arg2[%c472, %c0_90] : memref<488x128xf32, #tpu.memory_space<vmem>>, vector<1x32xf32>
    %111 = vector.broadcast %110 : vector<1x32xf32> to vector<3x32xf32>
    %112 = arith.mulf %109, %111 : vector<3x32xf32>
    %c480 = arith.constant 480 : index
    %c0_91 = arith.constant 0 : index
    %113 = vector.load %arg2[%c480, %c0_91] : memref<488x128xf32, #tpu.memory_space<vmem>>, vector<1x32xf32>
    %114 = vector.broadcast %113 : vector<1x32xf32> to vector<3x32xf32>
    %115 = arith.addf %112, %114 : vector<3x32xf32>
    %116 = vector.shape_cast %115 : vector<3x32xf32> to vector<1x3x32xf32>
    %c0_92 = arith.constant 0 : index
    %c0_93 = arith.constant 0 : index
    %c0_94 = arith.constant 0 : index
    %117 = vector.load %arg3[%c0_92, %c0_93, %c0_94] : memref<1x3x32xf32, #tpu.memory_space<vmem>>, vector<1x3x32xf32>
    tpu.vector_store %arg3[%c0_92, %c0_93, %c0_94], %116 {strides = array<i32>} : memref<1x3x32xf32, #tpu.memory_space<vmem>>, vector<1x3x32xf32>,
    return
  }
  func.func @transform_0(%arg0: i32) -> (i32, i32, i32) {
    %c0_i32 = arith.constant 0 : i32
    %c0_i32_0 = arith.constant 0 : i32
    %c0_i32_1 = arith.constant 0 : i32
    return %arg0, %c0_i32, %c0_i32_0 : i32, i32, i32
  }
  func.func @transform_1(%arg0: i32) -> (i32, i32) {
    %c0_i32 = arith.constant 0 : i32
    %c0_i32_0 = arith.constant 0 : i32
    %c0_i32_1 = arith.constant 0 : i32
    return %c0_i32, %c0_i32_0 : i32, i32
  }
  func.func @transform_2(%arg0: i32) -> (i32, i32, i32) {
    %c0_i32 = arith.constant 0 : i32
    %c0_i32_0 = arith.constant 0 : i32
    %c0_i32_1 = arith.constant 0 : i32
    return %arg0, %c0_i32, %c0_i32_0 : i32, i32, i32
  }
}

</mosaic_0001>

<bundles_post_ra>
// kernel: encoder_forward.1
= control target key start
LH: loop header
LB: loop body
LE: loop exit
PB: predicated region body
PF: predicated region fallthrough
CT: control target
= control target key end

     0   :  { %7 = vsyncpa [#allocation5], 0  ;;  %s2085_s0 = inlined_call_operand.hbm [shape: f32[2,16,16], index: 0, kind: input, shape index: {}]   ;;  %s2086_s1 = inlined_call_operand.hbm [shape: f32[488,128], index: 1, kind: input, shape index: {}]   ;;  %s2087_s2 = inlined_call_operand.vmem [shape: f32[2,3,32], index: 2, kind: output, shape index: {}]  }
   0x1   :  { %9 = vsyncpa [#allocation5 + $0x1], 0 }
   0x2   :  { %10 = vsyncpa [#allocation7], 0  ;;  %s1861_s9 = smov 0   ;;  %s1863_s10 = smov 0  }
   0x3   :  { %s1865_s11 = smov 0   ;;  %s1867_s12 = smov 0  }
   0x4 LB: > { %s1880_s13 = sadd.s32 4294967295, %s1837_s12   ;;  %p36_p0 = scmp.ne.s32.totalorder %s1829_s10, %s1825_s9  ;;  %s1837_s12 = sphi %s1867_s12, %s2102_s12   ;;  %s1833_s11 = sphi %s1865_s11, %s2101_s11   ;;  %s1829_s10 = sphi %s1863_s10, %s2100_s10   ;;  %s1825_s9 = sphi %s1861_s9, %s2099_s9  }
   0x5   : > { %p2088_p1 = scmp.eq.s32.totalorder %s1880_s13, 0  ;;  %p1350_p2 = scmp.ge.s32.totalorder %s1837_s12, 1 }
   0x6   : > { %p94_p3 = scmp.lt.s32.totalorder %s1837_s12, 3  ;;  %s1839_s16 = smov [#allocation6]  }
   0x7   : > { %p1888_p4 = por %p2088_p1, %p36_p0  ;;  %s106_s17 = sshll.u32 %s1839_s16, 4  ;;  %s107_s17 = int_to_ptr.vmem [resolvable:$true] %s106_s17 }
   0x8   : > { %p1892_p5 = pnand %p1350_p2, %p94_p3  ;;  %s1905_s19 = sadd.s32 1, %s1837_s12  }
   0x9   : > { %s2091_s14 = scalar_select %p1888_p4, 1, 0 }
   0xa   : > { %s2092_s15 = scalar_select %p1892_p5, 1, 0 }
   0xb   : > { %p1690_p6 = pneg %p1892_p5  ;;  %s23_s20 = sadd.s32 1, %s1833_s11 }
   0xc   : > { %s20_s21 = ssub.s32 %s1837_s12, %s1905_s19  ;;  %s1741_s24 = scalar_lea.hbm %s2086_s1, 7808 }
   0xd   : > { %p1900_p7 = pnand %p1690_p6, %p2088_p1  ;;  %p1742_p8 = scmp.ne.s32.totalorder %s2086_s1, %s1741_s24 }
   0xe   : > { %p1748_p12 = scmp.lt.u32.totalorder %s1741_s24, %s2086_s1 }
   0xf   : > { %p1743_p9 = pneg %p1900_p7 }
  0x11   : > { %p1744_p10 = pnand %p1743_p9, %p1742_p8 }
  0x13   : > { %p1745_p11 = pneg %p1744_p10 }
  0x15   : > { %p1750_p13 = pnand %p1748_p12, %p1745_p11 }
  0x17   : > { %1753 = shalt.err (!%p1750_p13)
}
  0x18   : > { %s1754_s29 = scalar_lea.vmem %s107_s17, 7808  ;;  %p1762_p6 = scmp.lt.s32.totalorder %s107_s17, %s107_s17 }
  0x19   : > { %p1755_p0 = scmp.ne.s32.totalorder %s107_s17, %s1754_s29  ;;  %p1763_p1 = scmp.lt.s32.totalorder %s1754_s29, %s1754_s29 }
  0x1b   : > { %p1757_p2 = pnand %p1755_p0, %p1743_p9  ;;  %p1764_p4 = por %p1763_p1, %p1762_p6 }
  0x1d   : > { %p1758_p3 = pneg %p1757_p2 }
  0x1f   : > { %p1765_p5 = pnand %p1764_p4, %p1758_p3 }
  0x21   : > { %1768 = shalt.err (!%p1765_p5)
}
  0x22   : > { %s1840_s30 = smov 128   ;;  %s1841_s3 = smov 8  }
  0x23   : > { %1693 = dma.hbm_to_vmem [thread:$0]  (!%p1900_p7), %s2086_s1, 7808, %s107_s17, [#allocation7], %s1840_s30, %s1840_s30, %s1841_s3  }
  0x24   : > { %p21_p1 = scmp.eq.s32.totalorder %s20_s21, 0  ;;  %p30_p4 = scmp.ne.s32.totalorder %s1833_s11, %s1829_s10 }
  0x25   : > { %p31_p5 = scmp.eq.s32.totalorder %s1837_s12, 0  ;;  %p1699_p8 = scmp.lt.s32.totalorder %s1837_s12, 2 }
  0x26   : > { %s1934_s6 = scalar_select %p21_p1, %s1833_s11, %s23_s20  }
  0x27   : > { %p32_p9 = por %p31_p5, %p30_p4  ;;  %s120_s7 = sand.u32 1, %s1833_s11  }
  0x28   : > { %s1353_s8 = sshll.u32 %s120_s7, 4  ;;  %s1384_s9 = sshll.u32 %s1837_s12, 8 }
  0x29   : > { %s1941_s18 = scalar_lea.hbm %s2085_s0, %s1384_s9  ;;  %s124_s17 = scalar_lea.vmem [#allocation4], %s1353_s8 }
  0x2a   : > { %s131_s21 = sshll.u32 %s124_s17, 4  ;;  %p1945_p7 = pnand %p1699_p8, %p32_p9  ;;  %s1943_s21 = int_to_ptr.vmem [resolvable:$true] %s131_s21 }
  0x2b   : > { %s1949_s12 = scalar_lea.sflag [#allocation5], %s120_s7  ;;  %s1769_s23 = scalar_lea.hbm %s1941_s18, 256 }
  0x2c   : > { %p1770_p10 = scmp.ne.s32.totalorder %s1941_s18, %s1769_s23  ;;  %p1771_p11 = pneg %p1945_p7 }
  0x2d   : > { %s1774_s26 = scalar_lea.hbm %s2085_s0, 512  ;;  %p1775_p0 = scmp.lt.u32.totalorder %s1941_s18, %s2085_s0 }
  0x2e   : > { %p1772_p12 = pnand %p1771_p11, %p1770_p10  ;;  %p1776_p2 = scmp.lt.u32.totalorder %s1774_s26, %s1769_s23 }
  0x2f   : > { %p1778_p6 = scmp.lt.u32.totalorder %s1769_s23, %s1941_s18 }
  0x30   : > { %p1773_p13 = pneg %p1772_p12  ;;  %p1777_p3 = por %p1776_p2, %p1775_p0 }
  0x32   : > { %p1779_p1 = por %p1778_p6, %p1777_p3 }
  0x34   : > { %p1780_p4 = pnand %p1779_p1, %p1773_p13 }
  0x36   : > { %1783 = shalt.err (!%p1780_p4)
}
  0x37   : > { %s1784_s29 = scalar_lea.vmem %s1943_s21, 256  ;;  %s1842_s4 = smov [#allocation4]  }
  0x38   : > { %p1785_p5 = scmp.ne.s32.totalorder %s1943_s21, %s1784_s29  ;;  %s1789_s5 = sshll.u32 %s1842_s4, 4  ;;  %s1790_s5 = int_to_ptr.vmem [resolvable:$false] %s1789_s5 }
  0x39   : > { %s1791_s7 = scalar_lea.vmem %s1790_s5, 512  ;;  %p1792_p10 = scmp.lt.s32.totalorder %s1943_s21, %s1790_s5 }
  0x3a   : > { %p1787_p8 = pnand %p1785_p5, %p1771_p11  ;;  %p1793_p12 = scmp.lt.s32.totalorder %s1791_s7, %s1784_s29 }
  0x3c   : > { %p1788_p9 = pneg %p1787_p8  ;;  %p1794_p0 = por %p1793_p12, %p1792_p10 }
  0x3e   : > { %p1795_p2 = pnand %p1794_p0, %p1788_p9 }
  0x40   : > { %1798 = shalt.err (!%p1795_p2)
}
  0x41   : > { %1697 = dma.hbm_to_vmem [thread:$0]  (!%p1945_p7), %s1941_s18, 256, %s1943_s21, %s1949_s12, %s1840_s30, %s1840_s30, %s1841_s3  }
  0x42   : > { %p2095_p11 = scmp.ne.s32.totalorder %s2092_s15, 0 }
  0x43   : > { %s145_s8 = sand.u32 (!%p2095_p11), 1, %s1829_s10   ;;  %p2096_p13 = scmp.ne.s32.totalorder (!%p2095_p11), %s2091_s14, 0 }
  0x44   : > { %143 = sbr.rel (%p2095_p11) target bundleno = 1555 (0x613), region = 28  ;;  %s1357_s9 = sshll.u32 (!%p2095_p11), %s145_s8, 4 }
  0x45   : > { %s146_s16 = scalar_lea.sflag (!%p2095_p11), [#allocation5], %s145_s8  ;;  %s1983_s22 = scalar_lea.vmem (!%p2095_p11), [#allocation4], %s1357_s9 }
  0x4b   : > { %1816 = dma.done.wait (%p2096_p13), %s146_s16, 256  }
  0x4c   : > { %1818 = vsyncadd (%p2096_p13), %s146_s16, 4294967040  ;;  %p2097_p3 = scmp.eq.s32.totalorder %s1880_s13, 0 }
  0x4e   : > { %1820 = dma.done.wait (%p2097_p3), [#allocation7], 7808   ;;  %p2098_p7 = pmov %p2097_p3 }
  0x4f   : > { %v1843_v0 = vmov 0.0|0.0   ;;  %vm1844_vm0 = vmmov 0   ;;  %v1845_v1 = vmov 0.0   ;;  %v182_v2 = vld [vmem:[#allocation6 + $0x10] sm:$0xff]  ;;  %v183_v3 = vld [vmem:[#allocation6 + $0x18] sm:$0xff]  ;;  %v178_v4 = vld [vmem:[#allocation6] sm:$0xff] }
  0x50   : > { %1822 = vsyncadd (%p2098_p7), [#allocation7], 4294959488  ;;  %1599 = vmatprep.subr.bf16.mxu0 %v1843_v0  ;;  %1602 = vmatprep.subr.bf16.mxu1 %v1843_v0  ;;  %v1600_v5 = vpack.c.bf16 %v183_v3, %v182_v2  ;;  %v179_v6 = vld [vmem:[#allocation6 + $0x8] sm:$0xff]  ;;  %v333_v7 = vld [vmem:[#allocation6 + $0x20] sm:$0xff]  ;;  %vm184_vm1 = vcmask 130048   ;;  %vm416_vm2 = vcmask 456704  }
  0x51   : > { %1456 = vmatprep.mubr.msk.f32.mxu0 %vm1844_vm0, %v1845_v1  ;;  %1463 = vmatprep.mubr.msk.f32.mxu1 %vm1844_vm0, %v1845_v1  ;;  %v1603_v8 = vpack.c.bf16 %v179_v6, %v178_v4  ;;  %v334_v9 = vld [vmem:[#allocation6 + $0x28] sm:$0xff]  ;;  %v428_v14 = vld [vmem:[#allocation6 + $0x70] sm:$0xff]  ;;  %v429_v15 = vld [vmem:[#allocation6 + $0x78] sm:$0xff]  ;;  %vm435_vm3 = vcmask 457728   ;;  %vm680_vm4 = vcmask 195584   ;;  %vm754_vm5 = vcmask 253952  }
  0x52   : > { %1601 = vmatpush3.bf16.msra.mxu0 %v1600_v5  ;;  %v1360_v10 = vld [vmem:[%s1983_s22 + $0x1] ss:$2 sm:$0x7f]  ;;  %v1606_v11 = vpack.c.bf16 %v334_v9, %v333_v7  ;;  %v177_v12 = vld [vmem:[%s1983_s22] ss:$2 sm:$0x7f]  ;;  %v1609_v16 = vpack.c.bf16 %v429_v15, %v428_v14 }
  0x53   : > { %1604 = vmatpush3.bf16.msra.mxu1 %v1603_v8  ;;  %1605 = vmatprep.subr.bf16.mxu0 %v1843_v0  ;;  %v1363_v13 = vld [vmem:[%s1983_s22 + $0x2] ss:$2 sm:$0x7f]  ;;  %v1365_v40 = vld [vmem:[#allocation6 + $0x30] ss:$0 sm:$0xff]  ;;  %vm757_vm6 = vcmask 256000  }
  0x54   : > { %1608 = vmatprep.subr.bf16.mxu1 %v1843_v0  ;;  %v419_v17 = vld [vmem:[#allocation6 + $0x38] sm:$0xff]  ;;  %v420_v18 = vld [vmem:[#allocation6 + $0x40] sm:$0xff]  ;;  %v431_v21 = vld [vmem:[#allocation6 + $0x88] sm:$0xff]  ;;  %755 = vst.msk [vmem:[#allocation3] sm:$0x1] %vm754_vm5, %v1845_v1  ;;  %vm765_vm7 = vcmask 261120  }
  0x55   : > { %1457 = vmatmul.mubr.msk.f32.vlgmr.msra.gmra.mrb[0].mxu0 %vm184_vm1, %v1360_v10  ;;  %v1618_v19 = vpack.c.bf16 %v420_v18, %v419_v17  ;;  %v430_v20 = vld [vmem:[#allocation6 + $0x80] sm:$0xff]  ;;  %v421_v23 = vld [vmem:[#allocation6 + $0x48] sm:$0xff]  ;;  %v422_v24 = vld [vmem:[#allocation6 + $0x50] sm:$0xff]  ;;  %756 = vst.msk [vmem:[#allocation3 + $0x4] sm:$0x1] %vm754_vm5, %v1845_v1  ;;  %p173_p6 = scmp.lt.s32.totalorder %s1880_s13, 1 }
  0x56   : > { %1464 = vmatmul.mubr.msk.f32.vlgmr.msra.gmra.mrb[0].mxu1 %vm184_vm1, %v177_v12  ;;  %1607 = vmatpush3.bf16.msra.mxu0 %v1606_v11  ;;  %v1612_v22 = vpack.c.bf16 %v431_v21, %v430_v20  ;;  %v1621_v25 = vpack.c.bf16 %v422_v24, %v421_v23  ;;  %v432_v26 = vld [vmem:[#allocation6 + $0x90] sm:$0xff]  ;;  %v433_v27 = vld [vmem:[#allocation6 + $0x98] sm:$0xff]  ;;  %v424_v30 = vld [vmem:[#allocation6 + $0x60] sm:$0xff] }
  0x57   : > { %1470 = vmatprep.mubr.msk.f32.mxu0 %vm1844_vm0, %v1845_v1  ;;  %1617 = vmatprep.subr.bf16.mxu0 %v1843_v0  ;;  %v423_v28 = vld [vmem:[#allocation6 + $0x58] sm:$0xff]  ;;  %v1615_v29 = vpack.c.bf16 %v433_v27, %v432_v26  ;;  %v434_v32 = vld [vmem:[#allocation6 + $0xa0] sm:$0xff]  ;;  %v425_v33 = vld [vmem:[#allocation6 + $0x68] sm:$0xff]  ;;  %s2104_s13 = smov (!%p173_p6, %s1880_s13), 1 }
  0x58   : > { %1487 = vmatprep.mubr.msk.f32.mxu1 %vm1844_vm0, %v1845_v1  ;;  %1610 = vmatpush3.bf16.msra.mxu1 %v1609_v16  ;;  %v1624_v31 = vpack.c.bf16 %v424_v30, %v423_v28  ;;  %v584_v45 = vld [vmem:[#allocation6 + $0xa8] sm:$0xff]  ;;  %v585_v46 = vld [vmem:[#allocation6 + $0xb0] sm:$0xff]  ;;  %v586_v48 = vld [vmem:[#allocation6 + $0xb8] sm:$0xff]  ;;  %s1359_s14 = sshll.u32 %s2104_s13, 2 }
  0x59   : > { %1471 = vmatmul.mubr.msk.f32.vlgmr.msra.gmra.mrb[2].mxu0 %vm184_vm1, %v1363_v13  ;;  %1611 = vmatprep.subr.bf16.mxu1 %v1843_v0  ;;  %v1627_v47 = vpack.c.bf16 %v585_v46, %v584_v45  ;;  %v587_v49 = vld [vmem:[#allocation6 + $0xc0] sm:$0xff]  ;;  %v588_v53 = vld [vmem:[#allocation6 + $0xc8] sm:$0xff]  ;;  %v589_v54 = vld [vmem:[#allocation6 + $0xd0] sm:$0xff]  ;;  %s176_s3 = scalar_lea.vmem %s2087_s2, %s1359_s14 }
  0x5a   : > { %1504 = vmatprep.mubr.msk.f32.mxu0 %vm1844_vm0, %v1845_v1  ;;  %1619 = vmatpush3.bf16.msra.mxu0 %v1618_v19  ;;  %v1630_v52 = vpack.c.bf16 %v587_v49, %v586_v48  ;;  %v1633_v55 = vpack.c.bf16 %v589_v54, %v588_v53  ;;  %v590_v56 = vld [vmem:[#allocation6 + $0xd8] sm:$0xff]  ;;  %v672_v58 = vld [vmem:[#allocation6 + $0xe8] sm:$0xff]  ;;  %v673_v59 = vld [vmem:[#allocation6 + $0xf0] sm:$0xff] }
  0x5b   : > { %1620 = vmatprep.subr.bf16.mxu0 %v1843_v0  ;;  %v1636_v60 = vpack.c.bf16 %v673_v59, %v672_v58  ;;  %v674_v61 = vld [vmem:[#allocation6 + $0xf8] sm:$0xff]  ;;  %v1369_v6 = vld [vmem:[#allocation6 + $0xe0] ss:$0 sm:$0xff]  ;;  %v761_v11 = vld [vmem:[#allocation6 + $0x108] sm:$0xff] }
  0x5c   : > { %1613 = vmatpush3.bf16.msra.mxu1 %v1612_v22  ;;  %v762_v12 = vld [vmem:[#allocation6 + $0x110] sm:$0xff]  ;;  %v763_v14 = vld [vmem:[#allocation6 + $0x118] sm:$0xff]  ;;  %v764_v15 = vld [vmem:[#allocation6 + $0x120] sm:$0xff] }
  0x5d   : > { %1614 = vmatprep.subr.bf16.mxu1 %v1843_v0  ;;  %v1639_v13 = vpack.c.bf16 %v762_v12, %v761_v11  ;;  %v1642_v16 = vpack.c.bf16 %v764_v15, %v763_v14  ;;  %v1370_v17 = vld [vmem:[#allocation6 + $0x100] ss:$0 sm:$0xff]  ;;  %v845_v21 = vld [vmem:[#allocation6 + $0x128] sm:$0xff]  ;;  %v846_v22 = vld [vmem:[#allocation6 + $0x130] sm:$0xff] }
  0x5e   : > { %1622 = vmatpush3.bf16.msra.mxu0 %v1621_v25  ;;  %v1645_v23 = vpack.c.bf16 %v846_v22, %v845_v21  ;;  %v847_v24 = vld [vmem:[#allocation6 + $0x138] sm:$0xff]  ;;  %v848_v25 = vld [vmem:[#allocation6 + $0x140] sm:$0xff]  ;;  %v924_v28 = vld [vmem:[#allocation6 + $0x148] sm:$0xff] }
  0x5f   : > { %1623 = vmatprep.subr.bf16.mxu0 %v1843_v0  ;;  %v1648_v27 = vpack.c.bf16 %v848_v25, %v847_v24  ;;  %v1090_v48 = vld [vmem:[#allocation6 + $0x198] sm:$0xff]  ;;  %v1168_v54 = vld [vmem:[#allocation6 + $0x1b0] sm:$0xff]  ;;  %v1171_v58 = vld [vmem:[#allocation6 + $0x1c8] sm:$0xff] }
  0x60   : > { %1616 = vmatpush3.bf16.msra.mxu1 %v1615_v29  ;;  %v925_v29 = vld [vmem:[#allocation6 + $0x150] sm:$0xff]  ;;  %v1381_v15 = vld [vmem:[#allocation6 + $0x1e0] ss:$0 sm:$0xff] }
  0x61   : > { %1485 = vmatprep.subr.mxu1 %v1845_v1  ;;  %v1651_v30 = vpack.c.bf16 %v925_v29, %v924_v28 }
  0x62   : > { %1625 = vmatpush3.bf16.msra.mxu0 %v1624_v31  ;;  %v926_v31 = vld [vmem:[#allocation6 + $0x158] sm:$0xff] }
  0x63   : > { %1502 = vmatprep.subr.mxu0 %v1845_v1 }
  0x64   : > { %1486 = vmatpush3.msra.mxu1 %v434_v32  ;;  %v927_v32 = vld [vmem:[#allocation6 + $0x160] sm:$0xff] }
  0x65   : > { %1626 = vmatprep.subr.bf16.mxu1 %v1843_v0 }
  0x66   : > { %1503 = vmatpush3.msra.mxu0 %v425_v33 }
  0x67   : > { %1635 = vmatprep.subr.bf16.mxu0 %v1843_v0 }
 0x128   : > { %v254_v34 = vpop.f32.mrb[0].mxu0 }
 0x129   : > { %v1458_v35 = vpop.f32.mrb[1].mxu0  ;;  %v327_v36 = vpop.f32.mrb[0].mxu1 }
 0x12a   : > { %v328_v37 = vadd.f32 %v327_v36, %v254_v34  ;;  %v1465_v38 = vpop.f32.mrb[1].mxu1  ;;  %v1654_v34 = vpack.c.bf16 %v927_v32, %v926_v31  ;;  %v1006_v36 = vld [vmem:[#allocation6 + $0x170] sm:$0xff] }
 0x12c   : > { %v404_v39 = vpop.f32.mrb[2].mxu0 }
 0x12d   : > { %v408_v41 = vadd.f32 %v404_v39, %v328_v37  ;;  %v1472_v42 = vpop.f32.mrb[3].mxu0  ;;  %v1007_v37 = vld [vmem:[#allocation6 + $0x178] sm:$0xff]  ;;  %v1008_v39 = vld [vmem:[#allocation6 + $0x180] sm:$0xff] }
 0x12e   : > { %v1657_v38 = vpack.c.bf16 %v1007_v37, %v1006_v36  ;;  %v1373_v42 = vld [vmem:[#allocation6 + $0x168] ss:$0 sm:$0xff] }
 0x12f   : > { %v414_v43 = vadd.f32 %v1365_v40, %v408_v41  ;;  %v1009_v40 = vld [vmem:[#allocation6 + $0x188] sm:$0xff] }
 0x130   : > { %v1660_v41 = vpack.c.bf16 %v1009_v40, %v1008_v39 }
 0x131   : > { %v415_v44 = vmax.f32 %v414_v43, 0.0 }
 0x133   : > { %417 = vst.msk [vmem:[#allocation2] sm:$0x7f] %vm416_vm2, %v415_v44 }
 0x13a   : > { %v427_v50 = vld [vmem:[#allocation2 + $0x1] ss:$2 sm:$0x7]  ;;  %v418_v51 = vld [vmem:[#allocation2] ss:$2 sm:$0x7] }
 0x13b   : > { %1488 = vmatmul.mubr.msk.f32.vlgmr.msra.gmra.mrb[2].mxu1 %vm435_vm3, %v427_v50  ;;  %1505 = vmatmul.mubr.msk.f32.vlgmr.msra.gmra.mrb[4].mxu0 %vm435_vm3, %v418_v51  ;;  %v583_v57 = vld [vmem:[#allocation2 + $0x2] ss:$2 sm:$0x7]  ;;  %v1091_v50 = vld [vmem:[#allocation6 + $0x1a0] sm:$0xff]  ;;  %v1092_v51 = vld [vmem:[#allocation6 + $0x1a8] sm:$0xff] }
 0x13c   : > { %1628 = vmatpush3.bf16.msra.mxu1 %v1627_v47  ;;  %1521 = vmatprep.mubr.msk.f32.mxu1 %vm1844_vm0, %v1845_v1  ;;  %v1089_v47 = vld [vmem:[#allocation6 + $0x190] sm:$0xff]  ;;  %v1666_v53 = vpack.c.bf16 %v1092_v51, %v1091_v50 }
 0x13d   : > { %1629 = vmatprep.subr.bf16.mxu1 %v1843_v0  ;;  %1530 = vmatprep.mubr.msk.f32.mxu0 %vm1844_vm0, %v1845_v1  ;;  %v1663_v49 = vpack.c.bf16 %v1090_v48, %v1089_v47 }
 0x13e   : > { %1637 = vmatpush3.bf16.msra.mxu0 %v1636_v60 }
 0x13f   : > { %1528 = vmatprep.subr.mxu0 %v1845_v1 }
 0x140   : > { %1631 = vmatpush3.bf16.msra.mxu1 %v1630_v52 }
 0x141   : > { %1632 = vmatprep.subr.bf16.mxu1 %v1843_v0 }
 0x142   : > { %1529 = vmatpush3.msra.mxu0 %v674_v61 }
 0x143   : > { %1638 = vmatprep.subr.bf16.mxu0 %v1843_v0 }
 0x144   : > { %1634 = vmatpush3.bf16.msra.mxu1 %v1633_v55  ;;  %v1169_v55 = vld [vmem:[#allocation6 + $0x1b8] sm:$0xff] }
 0x145   : > { %1519 = vmatprep.subr.mxu1 %v1845_v1 }
 0x148   : > { %1520 = vmatpush3.msra.mxu1 %v590_v56  ;;  %v1669_v56 = vpack.c.bf16 %v1169_v55, %v1168_v54 }
 0x149   : > { %1522 = vmatmul.mubr.msk.f32.vlgmr.msra.gmra.mrb[4].mxu1 %vm435_vm3, %v583_v57  ;;  %1656 = vmatprep.subr.bf16.mxu1 %v1843_v0  ;;  %v1170_v57 = vld [vmem:[#allocation6 + $0x1c0] sm:$0xff] }
 0x14a   : > { %1574 = vmatprep.mubr.msk.f32.mxu1 %vm1844_vm0, %v1845_v1  ;;  %1658 = vmatpush3.bf16.msra.mxu1 %v1657_v38  ;;  %v1672_v60 = vpack.c.bf16 %v1171_v58, %v1170_v57 }
 0x14b   : > { %1659 = vmatprep.subr.bf16.mxu1 %v1843_v0 }
 0x14e   : > { %1661 = vmatpush3.bf16.msra.mxu1 %v1660_v41 }
 0x14f   : > { %1662 = vmatprep.subr.bf16.mxu1 %v1843_v0 }
 0x20e   : > { %v505_v62 = vpop.f32.mrb[2].mxu1  ;;  %v578_v63 = vpop.f32.mrb[4].mxu0 }
 0x20f   : > { %v579_v2 = vadd.f32 %v578_v63, %v505_v62  ;;  %v1489_v3 = vpop.f32.mrb[3].mxu1  ;;  %v1506_v4 = vpop.f32.mrb[5].mxu0  ;;  %v1377_v62 = vld [vmem:[#allocation6 + $0x1d0] ss:$0 sm:$0xff] }
 0x21c   : > { %v660_v5 = vpop.f32.mrb[4].mxu1 }
 0x21d   : > { %v664_v7 = vadd.f32 %v660_v5, %v579_v2  ;;  %v1523_v8 = vpop.f32.mrb[5].mxu1 }
 0x21f   : > { %v670_v9 = vadd.f32 %v1369_v6, %v664_v7 }
 0x221   : > { %v671_v10 = vmax.f32 %v670_v9, 0.0 }
 0x223   : > { %1531 = vmatmul.mubr.msk.f32.vlgmr.msra.gmra.mrb[6].mxu0 %vm680_vm4, %v671_v10 }
 0x224   : > { %1541 = vmatprep.mubr.msk.f32.mxu0 %vm1844_vm0, %v1845_v1  ;;  %1640 = vmatpush3.bf16.msra.mxu0 %v1639_v13  ;;  %v1380_v13 = vld [vmem:[#allocation6 + $0x1d8] ss:$0 sm:$0xff] }
 0x225   : > { %1641 = vmatprep.subr.bf16.mxu0 %v1843_v0 }
 0x228   : > { %1643 = vmatpush3.bf16.msra.mxu0 %v1642_v16 }
 0x229   : > { %1644 = vmatprep.subr.bf16.mxu0 %v1843_v0 }
 0x2f6   : > { %v750_v18 = vpop.f32.mrb[6].mxu0 }
 0x2f7   : > { %v751_v19 = vadd.f32 %v1370_v17, %v750_v18  ;;  %v1532_v20 = vpop.f32.mrb[7].mxu0 }
 0x2f9   : > { %758 = vst.msk [vmem:[#allocation3 + $0x1] sm:$0x7] %vm757_vm6, %v751_v19 }
 0x300   : > { %v760_v26 = vld [vmem:[#allocation3] sm:$0x7] }
 0x301   : > { %1542 = vmatmul.mubr.msk.f32.vlgmr.msra.gmra.mrb[8].mxu0 %vm765_vm7, %v760_v26  ;;  %v844_v33 = vld [vmem:[#allocation3 + $0x1] sm:$0x7] }
 0x302   : > { %1646 = vmatpush3.bf16.msra.mxu0 %v1645_v23  ;;  %1552 = vmatprep.mubr.msk.f32.mxu0 %vm1844_vm0, %v1845_v1  ;;  %v923_v35 = vld [vmem:[#allocation3 + $0x2] sm:$0x7] }
 0x303   : > { %1647 = vmatprep.subr.bf16.mxu0 %v1843_v0 }
 0x306   : > { %1649 = vmatpush3.bf16.msra.mxu0 %v1648_v27 }
 0x307   : > { %1650 = vmatprep.subr.bf16.mxu0 %v1843_v0 }
 0x309   : > { %1553 = vmatmul.mubr.msk.f32.vlgmr.msra.gmra.mrb[8].mxu0 %vm765_vm7, %v844_v33 }
 0x30a   : > { %1652 = vmatpush3.bf16.msra.mxu0 %v1651_v30  ;;  %1563 = vmatprep.mubr.msk.f32.mxu0 %vm1844_vm0, %v1845_v1 }
 0x30b   : > { %1653 = vmatprep.subr.bf16.mxu0 %v1843_v0 }
 0x30e   : > { %1655 = vmatpush3.bf16.msra.mxu0 %v1654_v34 }
 0x311   : > { %1564 = vmatmul.mubr.msk.f32.vlgmr.msra.gmra.mrb[8].mxu0 %vm765_vm7, %v923_v35 }
 0x3e4   : > { %v997_v43 = vpop.f32.mrb[8].mxu0 }
 0x3e5   : > { %v1674_v44 = vadd.f32 %v1373_v42, %v997_v43  ;;  %v1565_v45 = vpop.f32.mrb[9].mxu0 }
 0x3e7   : > { %v1002_v46 = vmax.f32 %v1674_v44, 0.0 }
 0x3e9   : > { %1003 = vst.msk [vmem:[#allocation3 + $0x1] sm:$0x7] %vm757_vm6, %v1002_v46 }
 0x3f0   : > { %v1005_v52 = vld [vmem:[#allocation3] sm:$0x7] }
 0x3f1   : > { %1575 = vmatmul.mubr.msk.f32.vlgmr.msra.gmra.mrb[6].mxu1 %vm765_vm7, %v1005_v52  ;;  %v1088_v59 = vld [vmem:[#allocation3 + $0x1] sm:$0x7] }
 0x3f2   : > { %1664 = vmatpush3.bf16.msra.mxu1 %v1663_v49  ;;  %1585 = vmatprep.mubr.msk.f32.mxu1 %vm1844_vm0, %v1845_v1  ;;  %v1167_v61 = vld [vmem:[#allocation3 + $0x2] sm:$0x7] }
 0x3f3   : > { %1665 = vmatprep.subr.bf16.mxu1 %v1843_v0 }
 0x3f6   : > { %1667 = vmatpush3.bf16.msra.mxu1 %v1666_v53 }
 0x3f7   : > { %1668 = vmatprep.subr.bf16.mxu1 %v1843_v0 }
 0x3f9   : > { %1586 = vmatmul.mubr.msk.f32.vlgmr.msra.gmra.mrb[6].mxu1 %vm765_vm7, %v1088_v59 }
 0x3fa   : > { %1670 = vmatpush3.bf16.msra.mxu1 %v1669_v56  ;;  %1596 = vmatprep.mubr.msk.f32.mxu1 %vm1844_vm0, %v1845_v1 }
 0x3fb   : > { %1671 = vmatprep.subr.bf16.mxu1 %v1843_v0 }
 0x3fe   : > { %1673 = vmatpush3.bf16.msra.mxu1 %v1672_v60 }
 0x401   : > { %1597 = vmatmul.mubr.msk.f32.vlgmr.msra.gmra.mrb[6].mxu1 %vm765_vm7, %v1167_v61 }
 0x4d4   : > { %v1241_v63 = vpop.f32.mrb[6].mxu1 }
 0x4d5   : > { %v1675_v2 = vadd.f32 %v1377_v62, %v1241_v63  ;;  %v1598_v3 = vpop.f32.mrb[7].mxu1 }
 0x4d7   : > { %v1246_v4 = vmax.f32 %v1675_v2, 0.0 }
 0x4d9   : > { %v1247_v5 = vsel %vm757_vm6, %v1246_v4, 0.0 }
 0x4da   : > { %1248 = vadd.xlane.f32.xlu0 %v1247_v5 }
 0x567   : > { %v1249_v6 = vpop.xlane.xlu0 %1248 }
 0x568   : > { %v1251_v7 = vmul.f32 0.03125, %v1249_v6 }
 0x56a   : > { %v1252_v8 = vsub.f32 %v1246_v4, %v1251_v7 }
 0x56c   : > { %v1253_v1 = vmul.f32 %v1252_v8, %v1252_v8 }
 0x56e   : > { %v1254_v0 = vsel %vm757_vm6, %v1253_v1, 0.0 }
 0x56f   : > { %1255 = vadd.xlane.f32.xlu0 %v1254_v0 }
 0x5fc   : > { %v1256_v9 = vpop.xlane.xlu0 %1255 }
 0x5fd   : > { %v1257_v10 = vmul.f32 0.03125, %v1256_v9 }
 0x5ff   : > { %v1258_v11 = vadd.f32 1e-12, %v1257_v10 }
 0x601   : > { %1739 = vrsqrt.f32 %v1258_v11 }
 0x60b   : > { %v1740_v12 = vpop.eup %1739 }
 0x60c   : > { %v1260_v14 = vmul.f32 %v1740_v12, %v1252_v8 }
 0x60e   : > { %v1266_v16 = vmul.f32 %v1380_v13, %v1260_v14 }
 0x610   : > { %v1272_v17 = vadd.f32 %v1381_v15, %v1266_v16 }
 0x612   : > { %1273 = vst.msk [vmem:[%s176_s3] sm:$0x7] %vm757_vm6, %v1272_v17 }
 0x613 PF: > { %p13_p1 = scmp.ge.s32.totalorder %s1905_s19, 4   ;;  %s2099_s9 = smov %s1829_s10 }
 0x614   : > { %s2100_s10 = smov %s1833_s11  ;;  %s2101_s11 = smov %s1934_s6 }
 0x615   : > { %s2102_s12 = smov %s1905_s19  ;;  %15 = sbr.rel (!%p13_p1) target bundleno = 4 (0x4), region = 76 }
 0x61c   :  { %1293 = vsyncpa [#allocation5], 1 }
 0x61d   :  { %1295 = vsyncpa [#allocation5 + $0x1], 1 }
 0x61e   :  { %1296 = vsyncpa [#allocation7], 1 }

</bundles_post_ra>
